<compile_context>
chip_gen: v6e
topology: v6e:2x2x1
jax: 0.10.0
libtpu: 0.0.40
codegen_flags: <defaults>
</compile_context>

<pallas_src>
import functools

import jax
import jax.numpy as jnp
from jax.experimental import pallas as pl
from jax.experimental.pallas import tpu as pltpu


def _align(n, m):
    return (n + m - 1) // m * m


# ---------------------------------------------------------------------------
# Fused kernel: encoder MLP -> product-of-gaussians -> rsample/normalize ->
#               Tanh-Gaussian policy MLP -> one packed, lane-padded output slab
# ---------------------------------------------------------------------------
def fused_policy_kernel(ctx_ref, obs_ref, epsz_ref, epsa_ref, p_ref, out_ref, *,
                        num_tasks, ctx_batch, obs_batch, obs_dim, ctx_dim,
                        latent_dim, act_dim, hidden,
                        o_ew0, o_ew1, o_ew2, o_pw0, o_pw1, o_whd, o_bias,
                        out_width):
    X, Nc, b = num_tasks, ctx_batch, obs_batch
    O, C, L, A, H = obs_dim, ctx_dim, latent_dim, act_dim, hidden
    rows = X * b

    def dot(a, w):
        return jnp.dot(a, w, preferred_element_type=jnp.float32)

    def softplus(x):
        # single-branch numerically stable form: max(x,0) + log1p(exp(-|x|))
        return jnp.maximum(x, 0.0) + jnp.log1p(jnp.exp(-jnp.abs(x)))

    # ---- static-offset views into the single packed parameter slab ----
    ew0 = p_ref[o_ew0:o_ew0 + C, :H]
    ew1 = p_ref[o_ew1:o_ew1 + H, :H]
    ew2 = p_ref[o_ew2:o_ew2 + H, :2 * L]
    pw0o = p_ref[o_pw0:o_pw0 + O, :H]              # obs part of policy layer 0
    pw0z = p_ref[o_pw0 + O:o_pw0 + O + L, :H]      # z part of policy layer 0
    pw1 = p_ref[o_pw1:o_pw1 + H, :H]
    whd = p_ref[o_whd:o_whd + H, :2 * A]           # merged [mean | log_std] head
    eb0 = p_ref[o_bias + 0:o_bias + 1, :H]
    eb1 = p_ref[o_bias + 1:o_bias + 2, :H]
    eb2 = p_ref[o_bias + 2:o_bias + 3, :2 * L]
    pb0 = p_ref[o_bias + 3:o_bias + 4, :H]
    pb1 = p_ref[o_bias + 4:o_bias + 5, :H]
    bhd = p_ref[o_bias + 5:o_bias + 6, :2 * A]

    # ---- context encoder MLP: relu(x@W0+b0) -> relu(@W1+b1) -> @W2+b2 ----
    h = jnp.maximum(dot(ctx_ref[...], ew0) + eb0, 0.0)
    h = jnp.maximum(dot(h, ew1) + eb1, 0.0)
    params = (dot(h, ew2) + eb2).reshape(X, Nc, 2 * L)
    mu = params[..., :L]                            # (X, Nc, L)
    presig = params[..., L:]

    # ---- infer_posterior: product of Gaussians over the context batch ----
    # exact divides here (posterior stats may feed KL/contrastive losses)
    sig_sq = jnp.maximum(softplus(presig), 1e-7)
    recip = 1.0 / sig_sq
    sum_recip = jnp.sum(recip, axis=1)              # (X, L)
    var = 1.0 / sum_recip
    mean_z = var * jnp.sum(mu * recip, axis=1)

    # ---- sample_from_belief: rsample + F.normalize(p=2, dim=1) ----
    z = mean_z + jnp.sqrt(var) * epsz_ref[...]
    inv_norm = jax.lax.rsqrt(
        jnp.maximum(jnp.sum(z * z, axis=-1, keepdims=True), 1e-24))
    z = z * inv_norm                                # (X, L)

    # task_z rows are an output anyway; reuse them to feed the z-part of layer 0
    task_z = jnp.broadcast_to(z[:, None, :], (X, b, L)).reshape(rows, L)

    # ---- policy MLP: obs_z never materialized (two partial dots) ----
    h = jnp.maximum(dot(obs_ref[...], pw0o) + dot(task_z, pw0z) + pb0, 0.0)
    h = jnp.maximum(dot(h, pw1) + pb1, 0.0)
    head = dot(h, whd) + bhd                        # (rows, 2A)
    loc = head[:, :A]
    log_std = head[:, A:]
    std = jnp.exp(log_std)

    eps = epsa_ref[...]
    pre_tanh = loc + std * eps                      # rsample_with_pre_tanh_value
    actions = jnp.tanh(pre_tanh)

    half_log2pi = 0.5 * jnp.log(2.0 * jnp.pi)
    # Independent(Normal(loc,std),1).log_prob(pre_tanh); (pre_tanh-loc)/std == eps
    norm_lp = jnp.sum(-0.5 * eps * eps - log_std, axis=-1, keepdims=True) \
        - A * half_log2pi
    # tanh change-of-variables correction (clip_but_pass_gradient + 1e-6)
    corr = jnp.sum(jnp.log(jnp.clip(1.0 - actions * actions, 0.0, 1.0) + 1e-6),
                   axis=-1, keepdims=True)
    log_pi = norm_lp - corr

    # packed, lane-padded slab: [act | tanh(loc) | log_std | pre | task_z | lp | 0]
    used = 4 * A + L + 1
    parts = [actions, jnp.tanh(loc), log_std, pre_tanh, task_z, log_pi]
    if out_width > used:
        parts.append(jnp.zeros((rows, out_width - used), jnp.float32))
    out_ref[...] = jnp.concatenate(parts, axis=1)


# ---------------------------------------------------------------------------
# One-time parameter packing (done at parameter-load time, NOT in the hot path)
# ---------------------------------------------------------------------------
def pack_params(enc_params, pol_params, obs_dim, latent_dim, lane=128):
    ew0, eb0, ew1, eb1, ew2, eb2 = enc_params
    pw0, pb0, pw1, pb1, wm, bm, ws, bs = pol_params
    C, H = ew0.shape
    L, O, A = latent_dim, obs_dim, wm.shape[1]
    assert max(H, 2 * L, 2 * A, C) <= lane

    whd = jnp.concatenate([wm, ws], axis=1)         # (H, 2A) merged heads
    bhd = jnp.concatenate([bm, bs], axis=1)         # (1, 2A)

    mats = [("ew0", ew0), ("ew1", ew1), ("ew2", ew2),
            ("pw0", pw0), ("pw1", pw1), ("whd", whd)]
    offs, row = {}, 0
    for name, m in mats:
        offs[name] = row
        row += _align(m.shape[0], 8)
    offs["bias"] = row
    biases = [eb0, eb1, eb2, pb0, pb1, bhd]
    row += _align(len(biases), 8)
    total = _align(row, 8)

    slab = jnp.zeros((total, lane), jnp.float32)
    for name, m in mats:
        slab = slab.at[offs[name]:offs[name] + m.shape[0], :m.shape[1]].set(m)
    for i, bb in enumerate(biases):
        slab = slab.at[offs["bias"] + i:offs["bias"] + i + 1, :bb.shape[1]].set(bb)

    meta = dict(offs=offs, H=H, L=L, A=A, O=O, C=C)
    return slab, meta


# ---------------------------------------------------------------------------
# Forward wrapper: single pallas_call, grid=(1,), everything VMEM-resident.
# Returns the packed slab (pass it downstream unsliced); use unpack_outputs()
# only where the individual tensors are actually needed.
# ---------------------------------------------------------------------------
def cl_policy_forward(obs, context, eps_z, eps_a, param_slab, meta):
    X, Nc, C = context.shape
    t, b, O = obs.shape
    L, A, H = meta["L"], meta["A"], meta["H"]
    offs = meta["offs"]
    rows = t * b
    out_width = _align(4 * A + L + 1, 128)          # lane-dense unmasked store

    ctx_flat = context.reshape(X * Nc, C)           # free reshapes of contiguous arrays
    obs_flat = obs.reshape(rows, O)

    kernel = functools.partial(
        fused_policy_kernel, num_tasks=X, ctx_batch=Nc, obs_batch=b,
        obs_dim=O, ctx_dim=C, latent_dim=L, act_dim=A, hidden=H,
        o_ew0=offs["ew0"], o_ew1=offs["ew1"], o_ew2=offs["ew2"],
        o_pw0=offs["pw0"], o_pw1=offs["pw1"], o_whd=offs["whd"],
        o_bias=offs["bias"], out_width=out_width)

    inputs = (ctx_flat, obs_flat, eps_z, eps_a, param_slab)
    full2d = lambda a: pl.BlockSpec(a.shape, lambda i: (0, 0))

    return pl.pallas_call(
        kernel,
        out_shape=jax.ShapeDtypeStruct((rows, out_width), jnp.float32),
        grid=(1,),
        in_specs=[full2d(a) for a in inputs],
        out_specs=pl.BlockSpec((rows, out_width), lambda i: (0, 0)),
        compiler_params=pltpu.CompilerParams(dimension_semantics=("arbitrary",)),
    )(*inputs)


def unpack_outputs(out, act_dim, latent_dim):
    """Verification/debug helper only -- downstream code should keep the slab."""
    A, L = act_dim, latent_dim
    actions = out[:, :A]
    mean = out[:, A:2 * A]
    log_std = out[:, 2 * A:3 * A]
    pre_tanh = out[:, 3 * A:4 * A]
    task_z = out[:, 4 * A:4 * A + L]
    log_pi = out[:, 4 * A + L:4 * A + L + 1]
    return (actions, mean, log_std, log_pi, pre_tanh), task_z


# ---------------------------------------------------------------------------
# Pure-JAX reference (f32, mirrors the PyTorch module semantics)
# ---------------------------------------------------------------------------
def reference_forward(obs, context, enc_params, pol_params, eps_z, eps_a, latent_dim):
    w0, b0, w1, b1, w2, b2 = enc_params
    X, Nc, C = context.shape
    x = context.reshape(X * Nc, C)
    h = jax.nn.relu(x @ w0 + b0)
    h = jax.nn.relu(h @ w1 + b1)
    params = (h @ w2 + b2).reshape(X, Nc, 2 * latent_dim)
    mu = params[..., :latent_dim]
    sig = jnp.maximum(jax.nn.softplus(params[..., latent_dim:]), 1e-7)
    var = 1.0 / jnp.sum(1.0 / sig, axis=1)
    mean = var * jnp.sum(mu / sig, axis=1)
    z = mean + jnp.sqrt(var) * eps_z
    z = z / jnp.maximum(jnp.linalg.norm(z, axis=1, keepdims=True), 1e-12)
    t, b, O = obs.shape
    obs_flat = obs.reshape(t * b, O)
    task_z = jnp.repeat(z, b, axis=0)
    obs_z = jnp.concatenate([obs_flat, task_z], axis=1)
    pw0, pb0, pw1, pb1, wm, bm, ws, bs = pol_params
    h = jax.nn.relu(obs_z @ pw0 + pb0)
    h = jax.nn.relu(h @ pw1 + pb1)
    loc = h @ wm + bm
    log_std = h @ ws + bs
    std = jnp.exp(log_std)
    pre = loc + std * eps_a
    act = jnp.tanh(pre)
    nlp = jnp.sum(-0.5 * ((pre - loc) / std) ** 2 - log_std - 0.5 * jnp.log(2 * jnp.pi),
                  axis=-1, keepdims=True)
    corr = jnp.sum(jnp.log(jnp.clip(1 - act ** 2, 0.0, 1.0) + 1e-6),
                   axis=-1, keepdims=True)
    return (act, jnp.tanh(loc), log_std, nlp - corr, pre), task_z


# ---------------------------------------------------------------------------
def _linear_init(key, fan_in, fan_out):
    kw, kb = jax.random.split(key)
    w = jax.random.normal(kw, (fan_in, fan_out), jnp.float32) / jnp.sqrt(float(fan_in))
    b = 0.01 * jax.random.normal(kb, (1, fan_out), jnp.float32)
    return w, b


if __name__ == "__main__":
    # Small PEARL-like sizes: X tasks, Nc context transitions, B obs per task
    num_tasks = 2
    ctx_batch = 8
    obs_batch = 8
    obs_dim = 16
    act_dim = 4
    latent_dim = 8
    hidden = 64
    ctx_dim = obs_dim + act_dim + 1          # use_next_obs=False

    key = jax.random.PRNGKey(0)
    keys = jax.random.split(key, 12)

    # context encoder: C -> hidden -> hidden -> 2*latent_dim
    enc_params = (
        *_linear_init(keys[0], ctx_dim, hidden),
        *_linear_init(keys[1], hidden, hidden),
        *_linear_init(keys[2], hidden, 2 * latent_dim),
    )
    # policy: (O + L) -> hidden -> hidden -> {mean head, log_std head}
    pol_params = (
        *_linear_init(keys[3], obs_dim + latent_dim, hidden),
        *_linear_init(keys[4], hidden, hidden),
        *_linear_init(keys[5], hidden, act_dim),
        *_linear_init(keys[6], hidden, act_dim),
    )

    obs = jax.random.normal(keys[7], (num_tasks, obs_batch, obs_dim), jnp.float32)
    context = jax.random.normal(keys[8], (num_tasks, ctx_batch, ctx_dim), jnp.float32)
    # reparameterization noise (deterministic stand-in for rsample's fresh draws)
    eps_z = jax.random.normal(keys[9], (num_tasks, latent_dim), jnp.float32)
    eps_a = jax.random.normal(keys[10], (num_tasks * obs_batch, act_dim), jnp.float32)

    # one-time parameter packing (hot path only sees the single slab)
    param_slab, meta = pack_params(enc_params, pol_params, obs_dim, latent_dim)

    out_slab = cl_policy_forward(obs, context, eps_z, eps_a, param_slab, meta)
    jax.block_until_ready(out_slab)

    (acts, mean, log_std, log_pi, pre), task_z = unpack_outputs(
        out_slab, act_dim, latent_dim)
    (r_acts, r_mean, r_log_std, r_log_pi, r_pre), r_task_z = reference_forward(
        obs, context, enc_params, pol_params, eps_z, eps_a, latent_dim)

    for a, b_ in [(acts, r_acts), (mean, r_mean), (log_std, r_log_std),
                  (log_pi, r_log_pi), (pre, r_pre), (task_z, r_task_z)]:
        assert a.shape == b_.shape
        assert jnp.allclose(a, b_, rtol=2e-2, atol=2e-2), "mismatch vs reference"

    print("KERNEL_OK")
</pallas_src>

<mosaic_0001>
module attributes {stable_mosaic.version = 11 : i64} {
  func.func @fused_policy_kernel(%arg0: i32, %arg1: memref<16x21xf32, #tpu.memory_space<vmem>>, %arg2: memref<16x16xf32, #tpu.memory_space<vmem>>, %arg3: memref<2x8xf32, #tpu.memory_space<vmem>>, %arg4: memref<16x4xf32, #tpu.memory_space<vmem>>, %arg5: memref<312x128xf32, #tpu.memory_space<vmem>>, %arg6: memref<16x128xf32, #tpu.memory_space<vmem>>) attributes {dimension_semantics = [#tpu.dimension_semantics<arbitrary>], iteration_bounds = array<i64: 1>, scalar_prefetch = 0 : i64, scratch_operands = 0 : i64, tpu.core_type = #tpu.core_type<tc>, window_params = [{pipeline_mode = #tpu.pipeline_mode<synchronous>, transform_indices = @transform_0, window_bounds = array<i64: 16, 21>}, {pipeline_mode = #tpu.pipeline_mode<synchronous>, transform_indices = @transform_1, window_bounds = array<i64: 16, 16>}, {pipeline_mode = #tpu.pipeline_mode<synchronous>, transform_indices = @transform_2, window_bounds = array<i64: 2, 8>}, {pipeline_mode = #tpu.pipeline_mode<synchronous>, transform_indices = @transform_3, window_bounds = array<i64: 16, 4>}, {pipeline_mode = #tpu.pipeline_mode<synchronous>, transform_indices = @transform_4, window_bounds = array<i64: 312, 128>}, {pipeline_mode = #tpu.pipeline_mode<synchronous>, transform_indices = @transform_5, window_bounds = array<i64: 16, 128>}]} {
    %c0 = arith.constant 0 : index
    %c0_0 = arith.constant 0 : index
    %0 = vector.load %arg5[%c0, %c0_0] : memref<312x128xf32, #tpu.memory_space<vmem>>, vector<21x64xf32>
    %c24 = arith.constant 24 : index
    %c0_1 = arith.constant 0 : index
    %1 = vector.load %arg5[%c24, %c0_1] : memref<312x128xf32, #tpu.memory_space<vmem>>, vector<64x64xf32>
    %c88 = arith.constant 88 : index
    %c0_2 = arith.constant 0 : index
    %2 = vector.load %arg5[%c88, %c0_2] : memref<312x128xf32, #tpu.memory_space<vmem>>, vector<64x16xf32>
    %c152 = arith.constant 152 : index
    %c0_3 = arith.constant 0 : index
    %3 = vector.load %arg5[%c152, %c0_3] : memref<312x128xf32, #tpu.memory_space<vmem>>, vector<16x64xf32>
    %c168 = arith.constant 168 : index
    %c0_4 = arith.constant 0 : index
    %4 = vector.load %arg5[%c168, %c0_4] : memref<312x128xf32, #tpu.memory_space<vmem>>, vector<8x64xf32>
    %c176 = arith.constant 176 : index
    %c0_5 = arith.constant 0 : index
    %5 = vector.load %arg5[%c176, %c0_5] : memref<312x128xf32, #tpu.memory_space<vmem>>, vector<64x64xf32>
    %c240 = arith.constant 240 : index
    %c0_6 = arith.constant 0 : index
    %6 = vector.load %arg5[%c240, %c0_6] : memref<312x128xf32, #tpu.memory_space<vmem>>, vector<64x8xf32>
    %c304 = arith.constant 304 : index
    %c0_7 = arith.constant 0 : index
    %7 = vector.load %arg5[%c304, %c0_7] : memref<312x128xf32, #tpu.memory_space<vmem>>, vector<1x64xf32>
    %c305 = arith.constant 305 : index
    %c0_8 = arith.constant 0 : index
    %8 = vector.load %arg5[%c305, %c0_8] : memref<312x128xf32, #tpu.memory_space<vmem>>, vector<1x64xf32>
    %c306 = arith.constant 306 : index
    %c0_9 = arith.constant 0 : index
    %9 = vector.load %arg5[%c306, %c0_9] : memref<312x128xf32, #tpu.memory_space<vmem>>, vector<1x16xf32>
    %c307 = arith.constant 307 : index
    %c0_10 = arith.constant 0 : index
    %10 = vector.load %arg5[%c307, %c0_10] : memref<312x128xf32, #tpu.memory_space<vmem>>, vector<1x64xf32>
    %c308 = arith.constant 308 : index
    %c0_11 = arith.constant 0 : index
    %11 = vector.load %arg5[%c308, %c0_11] : memref<312x128xf32, #tpu.memory_space<vmem>>, vector<1x64xf32>
    %c309 = arith.constant 309 : index
    %c0_12 = arith.constant 0 : index
    %12 = vector.load %arg5[%c309, %c0_12] : memref<312x128xf32, #tpu.memory_space<vmem>>, vector<1x8xf32>
    %c0_13 = arith.constant 0 : index
    %c0_14 = arith.constant 0 : index
    %13 = vector.load %arg1[%c0_13, %c0_14] : memref<16x21xf32, #tpu.memory_space<vmem>>, vector<16x21xf32>
    %cst = arith.constant dense<0.000000e+00> : vector<16x64xf32>
    %14 = tpu.matmul %13, %0, %cst {dimension_numbers = #tpu.dot_dimension_numbers<[1], [0], [0], [1], [0, 0, 1, 1], [], []>} : vector<16x21xf32>, vector<21x64xf32>, vector<16x64xf32> -> vector<16x64xf32>
    %15 = vector.broadcast %7 : vector<1x64xf32> to vector<16x64xf32>
    %16 = arith.addf %14, %15 : vector<16x64xf32>
    %cst_15 = arith.constant 0.000000e+00 : f32
    %17 = vector.broadcast %cst_15 : f32 to vector<16x64xf32>
    %18 = arith.maximumf %16, %17 : vector<16x64xf32>
    %cst_16 = arith.constant dense<0.000000e+00> : vector<16x64xf32>
    %19 = tpu.matmul %18, %1, %cst_16 {dimension_numbers = #tpu.dot_dimension_numbers<[1], [0], [0], [1], [0, 0, 1, 1], [], []>} : vector<16x64xf32>, vector<64x64xf32>, vector<16x64xf32> -> vector<16x64xf32>
    %20 = vector.broadcast %8 : vector<1x64xf32> to vector<16x64xf32>
    %21 = arith.addf %19, %20 : vector<16x64xf32>
    %cst_17 = arith.constant 0.000000e+00 : f32
    %22 = vector.broadcast %cst_17 : f32 to vector<16x64xf32>
    %23 = arith.maximumf %21, %22 : vector<16x64xf32>
    %cst_18 = arith.constant dense<0.000000e+00> : vector<16x16xf32>
    %24 = tpu.matmul %23, %2, %cst_18 {dimension_numbers = #tpu.dot_dimension_numbers<[1], [0], [0], [1], [0, 0, 1, 1], [], []>} : vector<16x64xf32>, vector<64x16xf32>, vector<16x16xf32> -> vector<16x16xf32>
    %25 = vector.broadcast %9 : vector<1x16xf32> to vector<16x16xf32>
    %26 = arith.addf %24, %25 : vector<16x16xf32>
    %27 = vector.shape_cast %26 : vector<16x16xf32> to vector<2x8x16xf32>
    %28 = vector.extract_strided_slice %27 {offsets = [0, 0, 0], sizes = [2, 8, 8], strides = [1, 1, 1]} : vector<2x8x16xf32> to vector<2x8x8xf32>
    %29 = vector.extract_strided_slice %27 {offsets = [0, 0, 8], sizes = [2, 8, 8], strides = [1, 1, 1]} : vector<2x8x16xf32> to vector<2x8x8xf32>
    %cst_19 = arith.constant 0.000000e+00 : f32
    %30 = vector.broadcast %cst_19 : f32 to vector<2x8x8xf32>
    %31 = arith.maximumf %29, %30 : vector<2x8x8xf32>
    %32 = math.absf %29 : vector<2x8x8xf32>
    %cst_20 = arith.constant 0.000000e+00 : f32
    %33 = vector.broadcast %cst_20 : f32 to vector<2x8x8xf32>
    %34 = arith.subf %33, %32 : vector<2x8x8xf32>
    %35 = math.exp %34 : vector<2x8x8xf32>
    %36 = math.log1p %35 : vector<2x8x8xf32>
    %37 = arith.addf %31, %36 : vector<2x8x8xf32>
    %cst_21 = arith.constant 1.000000e-07 : f32
    %38 = vector.broadcast %cst_21 : f32 to vector<2x8x8xf32>
    %39 = arith.maximumf %37, %38 : vector<2x8x8xf32>
    %cst_22 = arith.constant 1.000000e+00 : f32
    %40 = vector.broadcast %cst_22 : f32 to vector<2x8x8xf32>
    %41 = arith.divf %40, %39 : vector<2x8x8xf32>
    %cst_23 = arith.constant dense<0.000000e+00> : vector<2x8xf32>
    %42 = vector.multi_reduction <add>, %41, %cst_23 [1] : vector<2x8x8xf32> to vector<2x8xf32>
    %cst_24 = arith.constant 1.000000e+00 : f32
    %43 = vector.broadcast %cst_24 : f32 to vector<2x8xf32>
    %44 = arith.divf %43, %42 : vector<2x8xf32>
    %45 = arith.mulf %28, %41 : vector<2x8x8xf32>
    %cst_25 = arith.constant dense<0.000000e+00> : vector<2x8xf32>
    %46 = vector.multi_reduction <add>, %45, %cst_25 [1] : vector<2x8x8xf32> to vector<2x8xf32>
    %47 = arith.mulf %44, %46 : vector<2x8xf32>
    %48 = math.sqrt %44 : vector<2x8xf32>
    %c0_26 = arith.constant 0 : index
    %c0_27 = arith.constant 0 : index
    %49 = vector.load %arg3[%c0_26, %c0_27] : memref<2x8xf32, #tpu.memory_space<vmem>>, vector<2x8xf32>
    %50 = arith.mulf %48, %49 : vector<2x8xf32>
    %51 = arith.addf %47, %50 : vector<2x8xf32>
    %52 = arith.mulf %51, %51 : vector<2x8xf32>
    %cst_28 = arith.constant dense<0.000000e+00> : vector<2xf32>
    %53 = vector.multi_reduction <add>, %52, %cst_28 [1] : vector<2x8xf32> to vector<2xf32>
    %54 = vector.shape_cast %53 : vector<2xf32> to vector<2x1xf32>
    %cst_29 = arith.constant 1.000000e-24 : f32
    %55 = vector.broadcast %cst_29 : f32 to vector<2x1xf32>
    %56 = arith.maximumf %54, %55 : vector<2x1xf32>
    %57 = math.rsqrt %56 : vector<2x1xf32>
    %58 = vector.broadcast %57 : vector<2x1xf32> to vector<2x8xf32>
    %59 = arith.mulf %51, %58 : vector<2x8xf32>
    %60 = vector.shape_cast %59 : vector<2x8xf32> to vector<2x1x8xf32>
    %61 = vector.shape_cast %60 : vector<2x1x8xf32> to vector<2x1x8xf32>
    %62 = vector.broadcast %61 : vector<2x1x8xf32> to vector<2x8x8xf32>
    %63 = vector.shape_cast %62 : vector<2x8x8xf32> to vector<16x8xf32>
    %c0_30 = arith.constant 0 : index
    %c0_31 = arith.constant 0 : index
    %64 = vector.load %arg2[%c0_30, %c0_31] : memref<16x16xf32, #tpu.memory_space<vmem>>, vector<16x16xf32>
    %cst_32 = arith.constant dense<0.000000e+00> : vector<16x64xf32>
    %65 = tpu.matmul %64, %3, %cst_32 {dimension_numbers = #tpu.dot_dimension_numbers<[1], [0], [0], [1], [0, 0, 1, 1], [], []>} : vector<16x16xf32>, vector<16x64xf32>, vector<16x64xf32> -> vector<16x64xf32>
    %cst_33 = arith.constant dense<0.000000e+00> : vector<16x64xf32>
    %66 = tpu.matmul %63, %4, %cst_33 {dimension_numbers = #tpu.dot_dimension_numbers<[1], [0], [0], [1], [0, 0, 1, 1], [], []>} : vector<16x8xf32>, vector<8x64xf32>, vector<16x64xf32> -> vector<16x64xf32>
    %67 = arith.addf %65, %66 : vector<16x64xf32>
    %68 = vector.broadcast %10 : vector<1x64xf32> to vector<16x64xf32>
    %69 = arith.addf %67, %68 : vector<16x64xf32>
    %cst_34 = arith.constant 0.000000e+00 : f32
    %70 = vector.broadcast %cst_34 : f32 to vector<16x64xf32>
    %71 = arith.maximumf %69, %70 : vector<16x64xf32>
    %cst_35 = arith.constant dense<0.000000e+00> : vector<16x64xf32>
    %72 = tpu.matmul %71, %5, %cst_35 {dimension_numbers = #tpu.dot_dimension_numbers<[1], [0], [0], [1], [0, 0, 1, 1], [], []>} : vector<16x64xf32>, vector<64x64xf32>, vector<16x64xf32> -> vector<16x64xf32>
    %73 = vector.broadcast %11 : vector<1x64xf32> to vector<16x64xf32>
    %74 = arith.addf %72, %73 : vector<16x64xf32>
    %cst_36 = arith.constant 0.000000e+00 : f32
    %75 = vector.broadcast %cst_36 : f32 to vector<16x64xf32>
    %76 = arith.maximumf %74, %75 : vector<16x64xf32>
    %cst_37 = arith.constant dense<0.000000e+00> : vector<16x8xf32>
    %77 = tpu.matmul %76, %6, %cst_37 {dimension_numbers = #tpu.dot_dimension_numbers<[1], [0], [0], [1], [0, 0, 1, 1], [], []>} : vector<16x64xf32>, vector<64x8xf32>, vector<16x8xf32> -> vector<16x8xf32>
    %78 = vector.broadcast %12 : vector<1x8xf32> to vector<16x8xf32>
    %79 = arith.addf %77, %78 : vector<16x8xf32>
    %80 = vector.extract_strided_slice %79 {offsets = [0, 0], sizes = [16, 4], strides = [1, 1]} : vector<16x8xf32> to vector<16x4xf32>
    %81 = vector.extract_strided_slice %79 {offsets = [0, 4], sizes = [16, 4], strides = [1, 1]} : vector<16x8xf32> to vector<16x4xf32>
    %82 = math.exp %81 : vector<16x4xf32>
    %c0_38 = arith.constant 0 : index
    %c0_39 = arith.constant 0 : index
    %83 = vector.load %arg4[%c0_38, %c0_39] : memref<16x4xf32, #tpu.memory_space<vmem>>, vector<16x4xf32>
    %84 = arith.mulf %82, %83 : vector<16x4xf32>
    %85 = arith.addf %80, %84 : vector<16x4xf32>
    %86 = math.tanh %85 : vector<16x4xf32>
    %cst_40 = arith.constant 6.28318548 : f32
    %87 = math.log %cst_40 : f32
    %cst_41 = arith.constant 5.000000e-01 : f32
    %88 = arith.mulf %cst_41, %87 : f32
    %cst_42 = arith.constant -5.000000e-01 : f32
    %89 = vector.broadcast %cst_42 : f32 to vector<16x4xf32>
    %90 = arith.mulf %89, %83 : vector<16x4xf32>
    %91 = arith.mulf %90, %83 : vector<16x4xf32>
    %92 = arith.subf %91, %81 : vector<16x4xf32>
    %cst_43 = arith.constant dense<0.000000e+00> : vector<16xf32>
    %93 = vector.multi_reduction <add>, %92, %cst_43 [1] : vector<16x4xf32> to vector<16xf32>
    %94 = vector.shape_cast %93 : vector<16xf32> to vector<16x1xf32>
    %cst_44 = arith.constant 4.000000e+00 : f32
    %95 = arith.mulf %cst_44, %88 : f32
    %96 = vector.broadcast %95 : f32 to vector<16x1xf32>
    %97 = arith.subf %94, %96 : vector<16x1xf32>
    %98 = arith.mulf %86, %86 : vector<16x4xf32>
    %cst_45 = arith.constant 1.000000e+00 : f32
    %99 = vector.broadcast %cst_45 : f32 to vector<16x4xf32>
    %100 = arith.subf %99, %98 : vector<16x4xf32>
    %cst_46 = arith.constant 0.000000e+00 : f32
    %cst_47 = arith.constant 1.000000e+00 : f32
    %101 = vector.broadcast %cst_46 : f32 to vector<16x4xf32>
    %102 = arith.maximumf %101, %100 : vector<16x4xf32>
    %103 = vector.broadcast %cst_47 : f32 to vector<16x4xf32>
    %104 = arith.minimumf %103, %102 : vector<16x4xf32>
    %cst_48 = arith.constant 9.99999997E-7 : f32
    %105 = vector.broadcast %cst_48 : f32 to vector<16x4xf32>
    %106 = arith.addf %104, %105 : vector<16x4xf32>
    %107 = math.log %106 : vector<16x4xf32>
    %cst_49 = arith.constant dense<0.000000e+00> : vector<16xf32>
    %108 = vector.multi_reduction <add>, %107, %cst_49 [1] : vector<16x4xf32> to vector<16xf32>
    %109 = vector.shape_cast %108 : vector<16xf32> to vector<16x1xf32>
    %110 = arith.subf %97, %109 : vector<16x1xf32>
    %111 = math.tanh %80 : vector<16x4xf32>
    %cst_50 = arith.constant 0.000000e+00 : f32
    %112 = vector.broadcast %cst_50 : f32 to vector<16x103xf32>
    %113 = tpu.concatenate %86, %111, %81, %85, %63, %110, %112 in 1 : vector<16x4xf32>, vector<16x4xf32>, vector<16x4xf32>, vector<16x4xf32>, vector<16x8xf32>, vector<16x1xf32>, vector<16x103xf32> -> vector<16x128xf32>
    %c0_51 = arith.constant 0 : index
    %c0_52 = arith.constant 0 : index
    %114 = vector.load %arg6[%c0_51, %c0_52] : memref<16x128xf32, #tpu.memory_space<vmem>>, vector<16x128xf32>
    tpu.vector_store %arg6[%c0_51, %c0_52], %113 {strides = array<i32>} : memref<16x128xf32, #tpu.memory_space<vmem>>, vector<16x128xf32>,
    return
  }
  func.func @transform_0(%arg0: i32) -> (i32, i32) {
    %c0_i32 = arith.constant 0 : i32
    %c0_i32_0 = arith.constant 0 : i32
    %c0_i32_1 = arith.constant 0 : i32
    return %c0_i32, %c0_i32_0 : i32, i32
  }
  func.func @transform_1(%arg0: i32) -> (i32, i32) {
    %c0_i32 = arith.constant 0 : i32
    %c0_i32_0 = arith.constant 0 : i32
    %c0_i32_1 = arith.constant 0 : i32
    return %c0_i32, %c0_i32_0 : i32, i32
  }
  func.func @transform_2(%arg0: i32) -> (i32, i32) {
    %c0_i32 = arith.constant 0 : i32
    %c0_i32_0 = arith.constant 0 : i32
    %c0_i32_1 = arith.constant 0 : i32
    return %c0_i32, %c0_i32_0 : i32, i32
  }
  func.func @transform_3(%arg0: i32) -> (i32, i32) {
    %c0_i32 = arith.constant 0 : i32
    %c0_i32_0 = arith.constant 0 : i32
    %c0_i32_1 = arith.constant 0 : i32
    return %c0_i32, %c0_i32_0 : i32, i32
  }
  func.func @transform_4(%arg0: i32) -> (i32, i32) {
    %c0_i32 = arith.constant 0 : i32
    %c0_i32_0 = arith.constant 0 : i32
    %c0_i32_1 = arith.constant 0 : i32
    return %c0_i32, %c0_i32_0 : i32, i32
  }
  func.func @transform_5(%arg0: i32) -> (i32, i32) {
    %c0_i32 = arith.constant 0 : i32
    %c0_i32_0 = arith.constant 0 : i32
    %c0_i32_1 = arith.constant 0 : i32
    return %c0_i32, %c0_i32_0 : i32, i32
  }
}

</mosaic_0001>

<bundles_post_ra>
// kernel: tpu_custom_call.1
= control target key start
LH: loop header
LB: loop body
LE: loop exit
PB: predicated region body
PF: predicated region fallthrough
CT: control target
= control target key end

     0   :  { %10 = vsyncpa [#allocation3], 0  ;;  %s1408_s0 = inlined_call_operand.vmem [shape: f32[16,21], index: 0, kind: input, shape index: {}]   ;;  %s1409_s1 = inlined_call_operand.hbm [shape: f32[16,16], index: 1, kind: input, shape index: {}]   ;;  %s1410_s2 = inlined_call_operand.vmem [shape: f32[2,8], index: 2, kind: input, shape index: {}]   ;;  %s1411_s3 = inlined_call_operand.vmem [shape: f32[16,4], index: 3, kind: input, shape index: {}]   ;;  %s1412_s4 = inlined_call_operand.hbm [shape: f32[312,128], index: 4, kind: input, shape index: {}]   ;;  %s1413_s5 = inlined_call_operand.hbm [shape: f32[16,128], index: 5, kind: output, shape index: {}]  }
   0x1   :  { %11 = vsyncpa [#allocation6], 0 }
   0x2   :  { %12 = vsyncpa [#allocation4], 0  ;;  %s1279_s18 = smov [#allocation2]  }
   0x3   :  { %s20_s19 = sshll.u32 %s1279_s18, 4  ;;  %s21_s19 = int_to_ptr.vmem [resolvable:$true] %s20_s19 }
   0x4   :  { %s1221_s20 = scalar_lea.vmem %s21_s19, 256  ;;  %p1226_p1 = scmp.lt.s32.totalorder %s21_s19, %s21_s19 }
   0x5   :  { %p1222_p0 = scmp.ne.s32.totalorder %s21_s19, %s1221_s20  ;;  %p1227_p2 = scmp.lt.s32.totalorder %s1221_s20, %s1221_s20 }
   0x7   :  { %p1228_p3 = por %p1227_p2, %p1226_p1 }
   0x9   :  { %p1229_p4 = pnand %p1228_p3, %p1222_p0 }
   0xb   :  { %1232 = shalt.err (!%p1229_p4)
}
   0xc   :  { %s1280_s21 = smov 128   ;;  %s1281_s22 = smov 8  }
   0xd   :  { %26 = dma.hbm_to_vmem [thread:$0]  %s1409_s1, 256, %s21_s19, [#allocation3], %s1280_s21, %s1280_s21, %s1281_s22  }
   0xe   :  { %s1282_s25 = smov [#allocation5]  }
   0xf   :  { %s36_s26 = sshll.u32 %s1282_s25, 4  ;;  %s37_s26 = int_to_ptr.vmem [resolvable:$true] %s36_s26 }
  0x10   :  { %s1241_s27 = scalar_lea.vmem %s37_s26, 4992  ;;  %p1246_p6 = scmp.lt.s32.totalorder %s37_s26, %s37_s26 }
  0x11   :  { %p1242_p5 = scmp.ne.s32.totalorder %s37_s26, %s1241_s27  ;;  %p1247_p7 = scmp.lt.s32.totalorder %s1241_s27, %s1241_s27 }
  0x13   :  { %p1248_p8 = por %p1247_p7, %p1246_p6 }
  0x15   :  { %p1249_p9 = pnand %p1248_p8, %p1242_p5 }
  0x17   :  { %1252 = shalt.err (!%p1249_p9)
}
  0x18   :  { %42 = dma.hbm_to_vmem [thread:$0]  %s1412_s4, 4992, %s37_s26, [#allocation6], %s1280_s21, %s1280_s21, %s1281_s22  }
  0x19   :  { %1273 = dma.done.wait [#allocation3], 256  }
  0x1a   :  { %1274 = vsyncadd [#allocation3], 4294967040 }
  0x1b   :  { %1275 = dma.done.wait [#allocation6], 4992  }
  0x1c   :  { %1276 = vsyncadd [#allocation6], 4294962304  ;;  %vm106_vm0 = vcmask 1044480   ;;  %vm99_vm1 = vcmask 171008   ;;  %v51_v0 = vld [vmem:[#allocation5 + $0x10] sm:$0x1f] }
  0x1d   :  { %v50_v1 = vld [vmem:[#allocation5 + $0x8] sm:$0xff]  ;;  %1069 = vmatprep.subr.msk.mxu0 %vm106_vm0, %v51_v0  ;;  %v93_v2 = vld [vmem:[%s1408_s0] sm:$0xff]  ;;  %v49_v4 = vld [vmem:[#allocation5] sm:$0xff]  ;;  %vm191_vm2 = vcmask 523264   ;;  %vm425_vm5 = vcmask 64512   ;;  %vm396_vm6 = vcmask 130112  }
  0x1e   :  { %v59_v3 = vld [vmem:[#allocation5 + $0x50] sm:$0xff]  ;;  %1070 = vmatpush3.msk.msra.mxu0 %vm106_vm0, %v51_v0  ;;  %1075 = vmatprep.mubr.msk.f32.mxu0 %vm99_vm1, %v93_v2  ;;  %v58_v5 = vld [vmem:[#allocation5 + $0x48] sm:$0xff]  ;;  %v94_v6 = vld [vmem:[%s1408_s0 + $0x8] sm:$0xff]  ;;  %vm482_vm11 = vcmask 1041409   ;;  %vm487_vm12 = vcmask 58368   ;;  %vm594_vm13 = vcmask 130048  }
  0x1f   :  { %1071 = vmatprep.subr.mxu0 %v50_v1  ;;  %1078 = vmatprep.subr.mxu1 %v59_v3  ;;  %v57_v7 = vld [vmem:[#allocation5 + $0x40] sm:$0xff]  ;;  %v56_v8 = vld [vmem:[#allocation5 + $0x38] sm:$0xff]  ;;  %v55_v9 = vld [vmem:[#allocation5 + $0x30] sm:$0xff]  ;;  %s1284_s10 = smov 4   ;;  %vm898_vm14 = vcmask 31744   ;;  %s1286_s13 = smov 12  }
  0x20   :  { %1072 = vmatpush3.msra.mxu0 %v50_v1  ;;  %1079 = vmatpush3.msra.mxu1 %v59_v3  ;;  %v54_v10 = vld [vmem:[#allocation5 + $0x28] sm:$0xff]  ;;  %v53_v11 = vld [vmem:[#allocation5 + $0x20] sm:$0xff]  ;;  %v52_v12 = vld [vmem:[#allocation5 + $0x18] sm:$0xff]  ;;  %vm963_vm15 = vcmask 97280   ;;  %vm968_vm0 = vcmask 195584   ;;  %s1287_s14 = smov [#allocation7]  }
  0x21   :  { %1073 = vmatprep.subr.mxu0 %v49_v4  ;;  %1080 = vmatprep.subr.mxu1 %v58_v5  ;;  %v67_v13 = vld [vmem:[#allocation5 + $0x90] sm:$0xff]  ;;  %v66_v14 = vld [vmem:[#allocation5 + $0x88] sm:$0xff]  ;;  %v65_v15 = vld [vmem:[#allocation5 + $0x80] sm:$0xff]  ;;  %s981_s15 = sshll.u32 %s1287_s14, 4  ;;  %s982_s15 = int_to_ptr.vmem [resolvable:$true] %s981_s15 }
  0x22   :  { %1074 = vmatpush3.msra.mxu0 %v49_v4  ;;  %1081 = vmatpush3.msra.mxu1 %v58_v5  ;;  %v64_v16 = vld [vmem:[#allocation5 + $0x78] sm:$0xff]  ;;  %v994_v17 = vld [vmem:[#allocation5 + $0x130] ss:$0 sm:$0xff]  ;;  %v62_v25 = vld [vmem:[#allocation5 + $0x68] sm:$0xff]  ;;  %s1253_s16 = scalar_lea.vmem %s982_s15, 256  ;;  %p1258_p11 = scmp.lt.s32.totalorder %s982_s15, %s982_s15 }
  0x23   :  { %1076 = vmatmul.mubr.msk.f32.vlgmr.msra.gmra.mxu0 %vm99_vm1, %v94_v6  ;;  %1082 = vmatprep.subr.mxu1 %v57_v7  ;;  %v63_v24 = vld [vmem:[#allocation5 + $0x70] sm:$0xff]  ;;  %v61_v26 = vld [vmem:[#allocation5 + $0x60] sm:$0xff]  ;;  %v60_v27 = vld [vmem:[#allocation5 + $0x58] sm:$0xff]  ;;  %vm971_vm1 = vcmask 203776   ;;  %p1254_p10 = scmp.ne.s32.totalorder %s982_s15, %s1253_s16  ;;  %p1259_p12 = scmp.lt.s32.totalorder %s1253_s16, %s1253_s16 }
  0x24   :  { %1083 = vmatpush3.msra.mxu1 %v57_v7  ;;  %1097 = vmatprep.subr.mxu0 %v67_v13  ;;  %v1343_v28 = vld [vmem:[%s1410_s2] sm:$0x3]  ;;  %v1001_v37 = vld [vmem:[#allocation5 + $0x132] ss:$0 sm:$0xff]  ;;  %s1283_s2 = smov 120  }
  0x25   :  { %1084 = vmatprep.subr.mxu1 %v56_v8  ;;  %1098 = vmatpush3.msra.mxu0 %v67_v13  ;;  %v466_v29 = vrot.slane %v1343_v28, 1  ;;  %v998_v30 = vld [vmem:[#allocation5 + $0x131] ss:$0 sm:$0xff]  ;;  %p1260_p13 = por %p1259_p12, %p1258_p11 }
  0x26   :  { %1085 = vmatpush3.msra.mxu1 %v56_v8  ;;  %1099 = vmatprep.subr.mxu0 %v66_v14 }
  0x27   :  { %1086 = vmatprep.subr.mxu1 %v55_v9  ;;  %1100 = vmatpush3.msra.mxu0 %v66_v14  ;;  %p1261_p0 = pnand %p1260_p13, %p1254_p10 }
  0x28   :  { %1087 = vmatpush3.msra.mxu1 %v55_v9  ;;  %1101 = vmatprep.subr.mxu0 %v65_v15 }
  0x29   :  { %1088 = vmatprep.subr.mxu1 %v54_v10  ;;  %1102 = vmatpush3.msra.mxu0 %v65_v15 }
  0x2a   :  { %1089 = vmatpush3.msra.mxu1 %v54_v10  ;;  %1103 = vmatprep.subr.mxu0 %v64_v16 }
  0x2b   :  { %1090 = vmatprep.subr.mxu1 %v53_v11  ;;  %1104 = vmatpush3.msra.mxu0 %v64_v16 }
  0x2c   :  { %1091 = vmatpush3.msra.mxu1 %v53_v11  ;;  %1105 = vmatprep.subr.mxu0 %v63_v24 }
  0x2d   :  { %1092 = vmatprep.subr.mxu1 %v52_v12  ;;  %1106 = vmatpush3.msra.mxu0 %v63_v24 }
  0x2e   :  { %1093 = vmatpush3.msra.mxu1 %v52_v12  ;;  %1107 = vmatprep.subr.mxu0 %v62_v25 }
  0x2f   :  { %1108 = vmatpush3.msra.mxu0 %v62_v25  ;;  %469 = vrot.lane.b32.xlu1 %v466_v29, %s1281_s22 }
  0x30   :  { %1109 = vmatprep.subr.mxu0 %v61_v26 }
  0x31   :  { %1110 = vmatpush3.msra.mxu0 %v61_v26 }
  0x32   :  { %1111 = vmatprep.subr.mxu0 %v60_v27 }
  0x33   :  { %1112 = vmatpush3.msra.mxu0 %v60_v27 }
  0xe3   :  { %v1077_v18 = vpop.f32.mrf.mxu0 }
  0xe4   :  { %v182_v19 = vadd.f32 %v1077_v18, %v994_v17 }
  0xe5   :  { %v176_v20 = vpop.f32.mrf.mxu0 }
  0xe6   :  { %v177_v21 = vadd.f32 %v994_v17, %v176_v20  ;;  %v186_v23 = vmax.f32 %v182_v19, 0.0 }
  0xe8   :  { %v185_v22 = vmax.f32 %v177_v21, 0.0 }
  0xea   :  { %1094 = vmatprep.mubr.msk.f32.mxu1 %vm191_vm2, %v185_v22 }
  0xeb   :  { %1095 = vmatmul.mubr.msk.f32.vlgmr.msra.gmra.mxu1 %vm191_vm2, %v186_v23 }
 0x1ab   :  { %v1096_v31 = vpop.f32.mrf.mxu1 }
 0x1ac   :  { %v270_v32 = vadd.f32 %v1096_v31, %v998_v30 }
 0x1ad   :  { %v264_v33 = vpop.f32.mrf.mxu1 }
 0x1ae   :  { %v265_v34 = vadd.f32 %v998_v30, %v264_v33  ;;  %v274_v36 = vmax.f32 %v270_v32, 0.0 }
 0x1b0   :  { %v273_v35 = vmax.f32 %v265_v34, 0.0 }
 0x1b2   :  { %1113 = vmatprep.mubr.msk.f32.mxu0 %vm191_vm2, %v273_v35 }
 0x1b3   :  { %1114 = vmatmul.mubr.msk.f32.vlgmr.msra.gmra.mxu0 %vm191_vm2, %v274_v36 }
 0x273   :  { %v1115_v38 = vpop.f32.mrf.mxu0 }
 0x274   :  { %v357_v39 = vadd.f32 %v1115_v38, %v1001_v37 }
 0x275   :  { %v351_v40 = vpop.f32.mrf.mxu0 }
 0x276   :  { %v363_v41 = vand.u32 2147483647, %v357_v39  ;;  %v352_v42 = vadd.f32 %v1001_v37, %v351_v40  ;;  %v361_v62 = vmax.f32 %v357_v39, 0.0 }
 0x278   :  { %v365_v43 = vsub.f32 0.0, %v363_v41  ;;  %v362_v44 = vand.u32 2147483647, %v352_v42  ;;  %v360_v3 = vmax.f32 %v352_v42, 0.0 }
 0x27a   :  { %v368_v45 = vmul.f32 1.442695, %v365_v43  ;;  %v364_v46 = vsub.f32 0.0, %v362_v44 }
 0x27c   :  { %1175 = vpow2.f32 %v368_v45  ;;  %v366_v47 = vmul.f32 1.442695, %v364_v46 }
 0x27e   :  { %1177 = vpow2.f32 %v366_v47 }
 0x289   :  { %v1176_v48 = vpop.eup %1175 }
 0x28a   :  { %v379_v49 = vadd.f32 1.0, %v1176_v48  ;;  %v382_v52 = vmul.f32 -0.5, %v1176_v48  ;;  %v385_v55 = vand.u32 2147483647, %v1176_v48 }
 0x28b   :  { %v1178_v50 = vpop.eup %1177 }
 0x28c   :  { %1179 = vlog2.f32 %v379_v49  ;;  %v370_v51 = vadd.f32 1.0, %v1178_v50  ;;  %v373_v53 = vmul.f32 -0.5, %v1178_v50  ;;  %v383_v54 = vadd.f32 1.0, %v382_v52 }
 0x28d   :  { %v376_v58 = vand.u32 2147483647, %v1178_v50  ;;  %vm386_vm3 = vcmp.lt.f32.partialorder %v385_v55, 0.0004427343 }
 0x28e   :  { %1181 = vlog2.f32 %v370_v51  ;;  %v374_v56 = vadd.f32 1.0, %v373_v53  ;;  %v384_v60 = vmul.f32 %v1176_v48, %v383_v54  ;;  %v470_v48 = vpop.permute.xlu1 %469 }
 0x28f   :  { %vm377_vm4 = vcmp.lt.f32.partialorder %v376_v58, 0.0004427343 }
 0x290   :  { %v375_v1 = vmul.f32 %v1178_v50, %v374_v56 }
 0x299   :  { %v1180_v57 = vpop.eup %1179 }
 0x29a   :  { %v381_v59 = vmul.f32 0.6931472, %v1180_v57 }
 0x29b   :  { %v1182_v61 = vpop.eup %1181 }
 0x29c   :  { %v387_v63 = vsel %vm386_vm3, %v384_v60, %v381_v59  ;;  %v372_v0 = vmul.f32 0.6931472, %v1182_v61 }
 0x29d   :  { %v389_v2 = vadd.f32 %v387_v63, %v361_v62 }
 0x29e   :  { %v378_v4 = vsel %vm377_vm4, %v375_v1, %v372_v0 }
 0x29f   :  { %v391_v5 = vmax.f32 %v389_v2, 1e-07  ;;  %v388_v6 = vadd.f32 %v378_v4, %v360_v3 }
 0x2a1   :  { %1183 = vrcp.f32 %v391_v5  ;;  %v390_v7 = vmax.f32 %v388_v6, 1e-07  ;;  %v70_v6 = vld [vmem:[#allocation5 + $0xa8] sm:$0xff] }
 0x2a2   :  { %1116 = vmatprep.subr.mxu1 %v70_v6 }
 0x2a3   :  { %1185 = vrcp.f32 %v390_v7  ;;  %1117 = vmatpush3.msra.mxu1 %v70_v6 }
 0x2ae   :  { %v1184_v8 = vpop.eup %1183 }
 0x2af   :  { %419 = vrot.lane.b32.xlu0 %v1184_v8, %s1283_s2  ;;  %v404_v29 = vsel %vm396_vm6, %v1184_v8, 0.0 }
 0x2b0   :  { %v1186_v9 = vpop.eup %1185  ;;  %v405_v30 = vrot.slane %v404_v29, 4 }
 0x2b1   :  { %v397_v31 = vsel %vm396_vm6, %v1186_v9, 0.0 }
 0x2b2   :  { %v406_v32 = vadd.f32 %v405_v30, %v404_v29  ;;  %v398_v33 = vrot.slane %v397_v31, 4  ;;  %v74_v29 = vld [vmem:[#allocation5 + $0xc8] sm:$0xff]  ;;  %v73_v30 = vld [vmem:[#allocation5 + $0xc0] sm:$0xff] }
 0x2b3   :  { %417 = vrot.lane.b32.xlu0 %v1186_v9, %s1283_s2  ;;  %v499_v9 = vlaneseq }
 0x2b4   :  { %v407_v34 = vrot.slane %v406_v32, 2  ;;  %v399_v35 = vadd.f32 %v398_v33, %v397_v31  ;;  %v72_v31 = vld [vmem:[#allocation5 + $0xb8] sm:$0xff]  ;;  %v86_v33 = vld [vmem:[#allocation5 + $0x128] sm:$0xff] }
 0x2b6   :  { %v408_v36 = vadd.f32 %v407_v34, %v406_v32  ;;  %v400_v37 = vrot.slane %v399_v35, 2  ;;  %v71_v32 = vld [vmem:[#allocation5 + $0xb0] sm:$0xff]  ;;  %v85_v34 = vld [vmem:[#allocation5 + $0x120] sm:$0xff] }
 0x2b8   :  { %v409_v38 = vrot.slane %v408_v36, 1 }
 0x2ba   :  { %v410_v40 = vadd.f32 %v409_v38, %v408_v36  ;;  %v83_v36 = vld [vmem:[#allocation5 + $0x110] sm:$0xff] }
 0x2bc   :  { %1187 = vrcp.f32 %v410_v40  ;;  %v1008_v40 = vld [vmem:[#allocation5 + $0x133] ss:$0 sm:$0xff] }
 0x321   :  { %v420_v10 = vpop.permute.xlu0 %419 }
 0x322   :  { %v424_v11 = vmul.f32 %v420_v10, %v357_v39  ;;  %v401_v39 = vadd.f32 %v400_v37, %v399_v35  ;;  %v69_v10 = vld [vmem:[#allocation5 + $0xa0] sm:$0xff]  ;;  %v84_v35 = vld [vmem:[#allocation5 + $0x118] sm:$0xff] }
 0x323   :  { %1121 = vmatprep.subr.mxu1 %v69_v10 }
 0x324   :  { %v433_v12 = vsel %vm425_vm5, %v424_v11, 0.0  ;;  %v402_v41 = vrot.slane %v401_v39, 1  ;;  %v500_v11 = vshrl.u32 %v499_v9, 7 }
 0x325   :  { %v434_v13 = vrot.slane %v433_v12, 4  ;;  %v418_v14 = vpop.permute.xlu0 %417 }
 0x326   :  { %v423_v15 = vmul.f32 %v418_v14, %v352_v42  ;;  %v403_v42 = vadd.f32 %v402_v41, %v401_v39  ;;  %v78_v14 = vld [vmem:[#allocation5 + $0xe8] sm:$0xff] }
 0x327   :  { %v435_v16 = vadd.f32 %v434_v13, %v433_v12  ;;  %v501_v12 = vsub.s32 0, %v500_v11  ;;  %1128 = vmatprep.subr.mxu0 %v78_v14 }
 0x328   :  { %v426_v17 = vsel %vm425_vm5, %v423_v15, 0.0  ;;  %1189 = vrcp.f32 %v403_v42  ;;  %1129 = vmatpush3.msra.mxu0 %v78_v14 }
 0x329   :  { %v427_v18 = vrot.slane %v426_v17, 4  ;;  %v436_v19 = vrot.slane %v435_v16, 2 }
 0x32b   :  { %v428_v20 = vadd.f32 %v427_v18, %v426_v17  ;;  %v437_v21 = vadd.f32 %v436_v19, %v435_v16 }
 0x32d   :  { %v438_v22 = vrot.slane %v437_v21, 1  ;;  %v429_v23 = vrot.slane %v428_v20, 2 }
 0x32f   :  { %v439_v24 = vadd.f32 %v438_v22, %v437_v21  ;;  %v430_v25 = vadd.f32 %v429_v23, %v428_v20  ;;  %v507_v21 = vld [vmem:[#allocation2] sm:$0xff]  ;;  %v68_v23 = vld [vmem:[#allocation5 + $0x98] sm:$0xff] }
 0x331   :  { %444 = vrot.lane.b32.xlu1 %v439_v24, %s1281_s22  ;;  %v431_v26 = vrot.slane %v430_v25, 1  ;;  %v508_v24 = vld [vmem:[#allocation2 + $0x8] sm:$0xff] }
 0x333   :  { %v432_v27 = vadd.f32 %v431_v26, %v430_v25  ;;  %v77_v25 = vld [vmem:[#allocation5 + $0xe0] sm:$0xff]  ;;  %v76_v26 = vld [vmem:[#allocation5 + $0xd8] sm:$0xff] }
 0x334   :  { %1130 = vmatprep.subr.mxu0 %v77_v25 }
 0x335   :  { %467 = vrot.lane.b32.xlu1 %v1343_v28, %s1281_s22  ;;  %442 = vrot.lane.b32.xlu0 %v432_v27, %s1281_s22  ;;  %v1188_v28 = vpop.eup %1187  ;;  %v75_v27 = vld [vmem:[#allocation5 + $0xd0] sm:$0xff] }
 0x336   :  { %1191 = vrsqrt.f32 %v1188_v28  ;;  %v1190_v43 = vpop.eup %1189  ;;  %vm459_vm7 = vcmp.eq.f32.partialorder %v1188_v28, inf  ;;  %v462_v49 = vand.u32 2147483648, %v1188_v28  ;;  %vm461_vm8 = vcmp.eq.f32.partialorder %v1188_v28, 0.0  ;;  %1131 = vmatpush3.msra.mxu0 %v77_v25 }
 0x337   :  { %1193 = vrsqrt.f32 %v1190_v43  ;;  %vm452_vm9 = vcmp.eq.f32.partialorder %v1190_v43, inf  ;;  %v455_v56 = vand.u32 2147483648, %v1190_v43  ;;  %vm454_vm10 = vcmp.eq.f32.partialorder %v1190_v43, 0.0  ;;  %1132 = vmatprep.subr.mxu0 %v76_v26 }
 0x338   :  { %1133 = vmatpush3.msra.mxu0 %v76_v26 }
 0x339   :  { %1134 = vmatprep.subr.mxu0 %v75_v27 }
 0x33a   :  { %1135 = vmatpush3.msra.mxu0 %v75_v27 }
 0x33b   :  { %1136 = vmatprep.subr.mxu0 %v74_v29 }
 0x33c   :  { %1137 = vmatpush3.msra.mxu0 %v74_v29 }
 0x33d   :  { %1138 = vmatprep.subr.mxu0 %v73_v30 }
 0x33e   :  { %1139 = vmatpush3.msra.mxu0 %v73_v30 }
 0x33f   :  { %1140 = vmatprep.subr.mxu0 %v72_v31 }
 0x340   :  { %1141 = vmatpush3.msra.mxu0 %v72_v31 }
 0x341   :  { %1142 = vmatprep.subr.mxu0 %v71_v32 }
 0x342   :  { %1143 = vmatpush3.msra.mxu0 %v71_v32 }
 0x343   :  { %v1192_v44 = vpop.eup %1191 }
 0x344   :  { %v458_v45 = vmul.f32 %v1192_v44, %v1188_v28  ;;  %v1194_v46 = vpop.eup %1193 }
 0x345   :  { %v451_v50 = vmul.f32 %v1194_v46, %v1190_v43 }
 0x346   :  { %v460_v47 = vsel %vm459_vm7, %v1188_v28, %v458_v45 }
 0x347   :  { %v463_v51 = vsel %vm461_vm8, %v462_v49, %v460_v47  ;;  %v453_v55 = vsel %vm452_vm9, %v1190_v43, %v451_v50  ;;  %v82_v47 = vld [vmem:[#allocation5 + $0x108] sm:$0xff]  ;;  %v80_v49 = vld [vmem:[#allocation5 + $0xf8] sm:$0xff]  ;;  %v79_v50 = vld [vmem:[#allocation5 + $0xf0] sm:$0xff] }
 0x348   :  { %v474_v53 = vmul.f32 %v470_v48, %v463_v51  ;;  %v456_v59 = vsel %vm454_vm10, %v455_v56, %v453_v55  ;;  %v81_v48 = vld [vmem:[#allocation5 + $0x100] sm:$0xff]  ;;  %v860_v51 = vld [vmem:[%s1411_s3] sm:$0xff] }
 0x3a3   :  { %v445_v52 = vpop.permute.xlu1 %444 }
 0x3a4   :  { %v449_v54 = vmul.f32 %v1188_v28, %v445_v52  ;;  %v861_v52 = vld [vmem:[%s1411_s3 + $0x8] sm:$0xff]  ;;  %s1285_s3 = smov 124  }
 0x3a6   :  { %v476_v57 = vadd.f32 %v474_v53, %v449_v54  ;;  %v1009_v53 = vld [vmem:[#allocation5 + $0x134] ss:$0 sm:$0xff] }
 0x3a7   :  { %v468_v58 = vpop.permute.xlu1 %467  ;;  %v443_v60 = vpop.permute.xlu0 %442 }
 0x3a8   :  { %v478_v61 = vmul.f32 %v476_v57, %v476_v57  ;;  %v473_v62 = vmul.f32 %v468_v58, %v456_v59  ;;  %v448_v63 = vmul.f32 %v1190_v43, %v443_v60  ;;  %v1012_v60 = vld [vmem:[#allocation5 + $0x135] ss:$0 sm:$0xff] }
 0x3aa   :  { %v475_v0 = vadd.f32 %v473_v62, %v448_v63  ;;  %v481_v1 = vrot.slane %v478_v61, 7 }
 0x3ac   :  { %v477_v2 = vmul.f32 %v475_v0, %v475_v0 }
 0x3ae   :  { %v483_v3 = vsel %vm482_vm11, %v481_v1, %v477_v2 }
 0x3af   :  { %484 = vrot.lane.b32.xlu0 %v483_v3, %s1283_s2 }
 0x421   :  { %v485_v4 = vpop.permute.xlu0 %484 }
 0x422   :  { %v488_v5 = vsel %vm487_vm12, %v485_v4, 0.0 }
 0x423   :  { %489 = vadd.xlane.f32.xlu1 %v488_v5 }
 0x4ac   :  { %v490_v7 = vpop.xlane.xlu1 %489 }
 0x4ad   :  { %v491_v8 = vmax.f32 %v490_v7, 1e-24 }
 0x4af   :  { %1195 = vrsqrt.f32 %v491_v8 }
 0x4bc   :  { %v1196_v13 = vpop.eup %1195 }
 0x4bd   :  { %v497_v15 = vmul.f32 %v1196_v13, %v475_v0  ;;  %v494_v16 = vrot.slane %v1196_v13, 1 }
 0x4bf   :  { %v1358_v17 = vrot.slane %v497_v15, %v501_v12  ;;  %v498_v18 = vmul.f32 %v494_v16, %v476_v57  ;;  %v885_v15 = vmul.f32 -0.5, %v861_v52 }
 0x4c1   :  { %511 = vrot.lane.b32.xlu0 %v1358_v17, %s1283_s2  ;;  %v1362_v19 = vrot.slane %v498_v18, %v501_v12  ;;  %v884_v12 = vmul.f32 -0.5, %v860_v51 }
 0x4c3   :  { %v886_v18 = vmul.f32 %v884_v12, %v860_v51 }
 0x4c5   :  { %513 = vrot.lane.b32.xlu0 %v1362_v19, %s1283_s2 }
 0x4c9   :  { %864 = vrot.lane.b32.xlu0 %v860_v51, %s1284_s10 }
 0x4cd   :  { %866 = vrot.lane.b32.xlu0 %v861_v52, %s1284_s10 }
 0x533   :  { %v512_v20 = vpop.permute.xlu0 %511 }
 0x534   :  { %1118 = vmatprep.mubr.msk.f32.mxu1 %vm425_vm5, %v512_v20 }
 0x537   :  { %v514_v22 = vpop.permute.xlu0 %513 }
 0x538   :  { %1119 = vmatmul.mubr.msk.f32.vlgmr.msra.gmra.mxu1 %vm425_vm5, %v514_v22  ;;  %v887_v22 = vmul.f32 %v885_v15, %v861_v52 }
 0x539   :  { %1122 = vmatpush3.msra.mxu1 %v69_v10  ;;  %1125 = vmatprep.mubr.msk.f32.mxu1 %vm594_vm13, %v507_v21 }
 0x53a   :  { %1123 = vmatprep.subr.mxu1 %v68_v23 }
 0x53b   :  { %1124 = vmatpush3.msra.mxu1 %v68_v23  ;;  %v865_v3 = vpop.permute.xlu0 %864 }
 0x53c   :  { %1126 = vmatmul.mubr.msk.f32.vlgmr.msra.gmra.mxu1 %vm594_vm13, %v508_v24  ;;  %1147 = vmatprep.subr.mxu1 %v86_v33 }
 0x53d   :  { %1148 = vmatpush3.msra.mxu1 %v86_v33 }
 0x53e   :  { %1149 = vmatprep.subr.mxu1 %v85_v34 }
 0x53f   :  { %1150 = vmatpush3.msra.mxu1 %v85_v34  ;;  %v867_v8 = vpop.permute.xlu0 %866 }
 0x540   :  { %1151 = vmatprep.subr.mxu1 %v84_v35 }
 0x541   :  { %1152 = vmatpush3.msra.mxu1 %v84_v35 }
 0x542   :  { %1153 = vmatprep.subr.mxu1 %v83_v36 }
 0x543   :  { %1154 = vmatpush3.msra.mxu1 %v83_v36 }
 0x544   :  { %1155 = vmatprep.subr.mxu1 %v82_v47 }
 0x545   :  { %1156 = vmatpush3.msra.mxu1 %v82_v47 }
 0x546   :  { %1157 = vmatprep.subr.mxu1 %v81_v48 }
 0x547   :  { %1158 = vmatpush3.msra.mxu1 %v81_v48 }
 0x548   :  { %1159 = vmatprep.subr.mxu1 %v80_v49 }
 0x549   :  { %1160 = vmatpush3.msra.mxu1 %v80_v49 }
 0x54a   :  { %1161 = vmatprep.subr.mxu1 %v79_v50 }
 0x54b   :  { %1162 = vmatpush3.msra.mxu1 %v79_v50 }
 0x5f8   :  { %v1120_v37 = vpop.f32.mrf.mxu1 }
 0x5fa   :  { %v585_v38 = vpop.f32.mrf.mxu1 }
 0x5fc   :  { %v1127_v39 = vpop.f32.mrf.mxu1 }
 0x5fd   :  { %v673_v41 = vadd.f32 %v1127_v39, %v1120_v37 }
 0x5fe   :  { %v667_v42 = vpop.f32.mrf.mxu1 }
 0x5ff   :  { %v668_v28 = vadd.f32 %v667_v42, %v585_v38  ;;  %v681_v43 = vadd.f32 %v1008_v40, %v673_v41 }
 0x601   :  { %v680_v44 = vadd.f32 %v1008_v40, %v668_v28  ;;  %v683_v46 = vmax.f32 %v681_v43, 0.0 }
 0x603   :  { %v682_v45 = vmax.f32 %v680_v44, 0.0 }
 0x605   :  { %1144 = vmatprep.mubr.msk.f32.mxu0 %vm191_vm2, %v682_v45 }
 0x606   :  { %1145 = vmatmul.mubr.msk.f32.vlgmr.msra.gmra.mxu0 %vm191_vm2, %v683_v46 }
 0x6c6   :  { %v1146_v54 = vpop.f32.mrf.mxu0 }
 0x6c7   :  { %v766_v55 = vadd.f32 %v1146_v54, %v1009_v53 }
 0x6c8   :  { %v760_v56 = vpop.f32.mrf.mxu0 }
 0x6c9   :  { %v761_v57 = vadd.f32 %v1009_v53, %v760_v56  ;;  %v770_v59 = vmax.f32 %v766_v55, 0.0 }
 0x6cb   :  { %v769_v58 = vmax.f32 %v761_v57, 0.0 }
 0x6cd   :  { %1163 = vmatprep.mubr.msk.f32.mxu1 %vm191_vm2, %v769_v58 }
 0x6ce   :  { %1164 = vmatmul.mubr.msk.f32.vlgmr.msra.gmra.mxu1 %vm191_vm2, %v770_v59 }
 0x78e   :  { %v1165_v61 = vpop.f32.mrf.mxu1 }
 0x78f   :  { %v853_v62 = vadd.f32 %v1165_v61, %v1012_v60 }
 0x790   :  { %v847_v63 = vpop.f32.mrf.mxu1 }
 0x791   :  { %v848_v0 = vadd.f32 %v1012_v60, %v847_v63  ;;  %v858_v1 = vmul.f32 1.442695, %v853_v62 }
 0x793   :  { %v856_v2 = vmul.f32 1.442695, %v848_v0  ;;  %1197 = vtanh.f32 %v848_v0 }
 0x795   :  { %1199 = vpow2.f32 %v856_v2 }
 0x796   :  { %1201 = vpow2.f32 %v858_v1 }
 0x797   :  { %1203 = vtanh.f32 %v853_v62 }
 0x7a0   :  { %v1198_v4 = vpop.eup %1197 }
 0x7a1   :  { %933 = vrot.lane.b32.xlu1 %v1198_v4, %s1284_s10 }
 0x7a2   :  { %v1200_v5 = vpop.eup %1199 }
 0x7a3   :  { %v870_v6 = vmul.f32 %v1200_v5, %v865_v3  ;;  %v1202_v7 = vpop.eup %1201 }
 0x7a4   :  { %v1204_v9 = vpop.eup %1203  ;;  %v871_v10 = vmul.f32 %v1202_v7, %v867_v8 }
 0x7a5   :  { %874 = vrot.lane.b32.xlu0 %v870_v6, %s1285_s3  ;;  %935 = vrot.lane.b32.xlu1 %v1204_v9, %s1284_s10 }
 0x7a9   :  { %876 = vrot.lane.b32.xlu0 %v871_v10, %s1285_s3 }
 0x7ad   :  { %890 = vrot.lane.b32.xlu0 %v848_v0, %s1285_s3 }
 0x7b1   :  { %892 = vrot.lane.b32.xlu0 %v853_v62, %s1285_s3 }
 0x813   :  { %v934_v26 = vpop.permute.xlu1 %933 }
 0x817   :  { %v875_v11 = vpop.permute.xlu0 %874  ;;  %v936_v32 = vpop.permute.xlu1 %935 }
 0x818   :  { %v880_v13 = vadd.f32 %v875_v11, %v848_v0 }
 0x81a   :  { %1205 = vtanh.f32 %v880_v13 }
 0x81b   :  { %v877_v14 = vpop.permute.xlu0 %876 }
 0x81c   :  { %v881_v16 = vadd.f32 %v877_v14, %v853_v62 }
 0x81e   :  { %1207 = vtanh.f32 %v881_v16 }
 0x81f   :  { %v891_v20 = vpop.permute.xlu0 %890 }
 0x820   :  { %v896_v21 = vsub.f32 %v886_v18, %v891_v20 }
 0x822   :  { %v899_v23 = vsel %vm898_vm14, %v896_v21, 0.0 }
 0x823   :  { %900 = vadd.xlane.f32.xlu0 %v899_v23  ;;  %v893_v24 = vpop.permute.xlu0 %892 }
 0x824   :  { %v897_v25 = vsub.f32 %v887_v22, %v893_v24 }
 0x826   :  { %v902_v27 = vsel %vm898_vm14, %v897_v25, 0.0 }
 0x827   :  { %v1206_v29 = vpop.eup %1205  ;;  %903 = vadd.xlane.f32.xlu1 %v902_v27 }
 0x828   :  { %v959_v30 = vsel %vm898_vm14, %v1206_v29, %v934_v26  ;;  %v907_v36 = vmul.f32 %v1206_v29, %v1206_v29 }
 0x82a   :  { %v909_v38 = vsub.f32 1.0, %v907_v36 }
 0x82b   :  { %v1208_v31 = vpop.eup %1207 }
 0x82c   :  { %v960_v33 = vsel %vm898_vm14, %v1208_v31, %v936_v32  ;;  %v908_v34 = vmul.f32 %v1208_v31, %v1208_v31  ;;  %v911_v40 = vmax.f32 %v909_v38, 0.0 }
 0x82e   :  { %v910_v35 = vsub.f32 1.0, %v908_v34  ;;  %v913_v42 = vmin.f32 %v911_v40, 1.0 }
 0x830   :  { %v912_v37 = vmax.f32 %v910_v35, 0.0  ;;  %v915_v28 = vadd.f32 1e-06, %v913_v42 }
 0x832   :  { %v914_v39 = vmin.f32 %v912_v37, 1.0 }
 0x834   :  { %v916_v41 = vadd.f32 1e-06, %v914_v39 }
 0x836   :  { %1209 = vlog2.f32 %v916_v41 }
 0x837   :  { %1211 = vlog2.f32 %v915_v28 }
 0x838   :  { %941 = vrot.lane.b32.xlu1 %v853_v62, %s1284_s10 }
 0x839   :  { %939 = vrot.lane.b32.xlu0 %v848_v0, %s1284_s10 }
 0x83c   :  { %953 = vrot.lane.b32.xlu1 %v1358_v17, %s1281_s22 }
 0x840   :  { %949 = vrot.lane.b32.xlu1 %v881_v16, %s1286_s13 }
 0x843   :  { %v1210_v43 = vpop.eup %1209 }
 0x844   :  { %947 = vrot.lane.b32.xlu1 %v880_v13, %s1286_s13  ;;  %v920_v44 = vmul.f32 0.6931472, %v1210_v43  ;;  %v1212_v45 = vpop.eup %1211 }
 0x845   :  { %v918_v46 = vmul.f32 0.6931472, %v1212_v45 }
 0x846   :  { %v924_v17 = vsel %vm898_vm14, %v920_v44, 0.0 }
 0x847   :  { %v921_v47 = vsel %vm898_vm14, %v918_v46, 0.0 }
 0x868   :  { %925 = vadd.xlane.f32.xlu1 %v924_v17 }
 0x86c   :  { %922 = vadd.xlane.f32.xlu1 %v921_v47 }
 0x87d   :  { %955 = vrot.lane.b32.xlu1 %v1362_v19, %s1281_s22 }
 0x8ac   :  { %v901_v52 = vpop.xlane.xlu0 %900 }
 0x8ad   :  { %v1015_v57 = vadd.f32 -3.675754, %v901_v52 }
 0x8b0   :  { %v904_v48 = vpop.xlane.xlu1 %903  ;;  %v940_v54 = vpop.permute.xlu0 %939 }
 0x8b1   :  { %v961_v56 = vsel %vm425_vm5, %v959_v30, %v940_v54  ;;  %v1016_v61 = vadd.f32 -3.675754, %v904_v48 }
 0x8b4   :  { %v942_v49 = vpop.permute.xlu1 %941 }
 0x8b5   :  { %v962_v62 = vsel %vm425_vm5, %v960_v33, %v942_v49 }
 0x8b8   :  { %v954_v50 = vpop.permute.xlu1 %953 }
 0x8bc   :  { %v950_v51 = vpop.permute.xlu1 %949 }
 0x8bd   :  { %v965_v0 = vsel %vm963_vm15, %v962_v62, %v950_v51 }
 0x8c0   :  { %v948_v53 = vpop.permute.xlu1 %947 }
 0x8c1   :  { %v964_v58 = vsel %vm963_vm15, %v961_v56, %v948_v53 }
 0x8c2   :  { %v966_v19 = vsel %vm594_vm13, %v964_v58, %v954_v50 }
 0x8f1   :  { %v926_v55 = vpop.xlane.xlu1 %925 }
 0x8f2   :  { %v928_v1 = vsub.f32 %v1016_v61, %v926_v55 }
 0x8f5   :  { %v923_v59 = vpop.xlane.xlu1 %922 }
 0x8f6   :  { %v927_v60 = vsub.f32 %v1015_v57, %v923_v59 }
 0x8f8   :  { %v969_v63 = vsel %vm968_vm0, %v966_v19, %v927_v60 }
 0x8f9   :  { %v956_v2 = vpop.permute.xlu1 %955  ;;  %v972_v3 = vsel %vm971_vm1, %v969_v63, 0.0 }
 0x8fa   :  { %v967_v4 = vsel %vm594_vm13, %v965_v0, %v956_v2  ;;  %974 = vst [vmem:[#allocation7] sm:$0xff] %v972_v3 }
 0x8fb   :  { %v970_v5 = vsel %vm968_vm0, %v967_v4, %v928_v1 }
 0x8fc   :  { %v973_v6 = vsel %vm971_vm1, %v970_v5, 0.0 }
 0x8fd   :  { %975 = vst [vmem:[#allocation7 + $0x8] sm:$0xff] %v973_v6 }
 0x8fe   :  { %1264 = shalt.err (!%p1261_p0)
}
 0x8ff   :  { %987 = dma.vmem_to_hbm [thread:$0]  %s982_s15, 256, %s1413_s5, [#allocation4], %s1280_s21, %s1280_s21, %s1281_s22  }
 0x900   :  { %1277 = dma.done.wait [#allocation4], 256  }
 0x901   :  { %1278 = vsyncadd [#allocation4], 4294967040 }
 0x902   :  { %991 = vsyncpa [#allocation3], 1 }
 0x903   :  { %992 = vsyncpa [#allocation6], 1 }
 0x904   :  { %993 = vsyncpa [#allocation4], 1 }

</bundles_post_ra>
